<compile_context>
chip_gen: v6e
topology: v6e:2x2x1
jax: 0.10.0
libtpu: 0.0.40
codegen_flags: <defaults>
</compile_context>

<pallas_src>
import functools
import math

import numpy as np
import jax
import jax.numpy as jnp
from jax.experimental import pallas as pl
from jax.experimental.pallas import tpu as pltpu


# ----------------------------------------------------------------------------
# Fused FcaNet kernel: the whole block stack, one grid step per batch element.
# ----------------------------------------------------------------------------
def _fcanet_kernel(*args, block_has_down, H, W, C):
    x_ref = args[0]
    o_ref = args[-2]
    pad_ref = args[-1]
    param_refs = args[1:-2]
    WC = W * C

    # Invariant: only rows 1..H of pad_ref are ever written by the convs below,
    # so keeping the two halo rows zero is enough for the vertical zero padding.
    # Re-zero them every grid step (1 KB) so the kernel is correct even when the
    # parallel grid axis is split across TensorCores with independent scratch.
    zrow = jnp.zeros((1, WC), pad_ref.dtype)
    pad_ref[0:1, :] = zrow
    pad_ref[H + 1:H + 2, :] = zrow

    def conv3x3_bn(act, w_ref, b_ref):
        # act: (H, W*C) f32.  One MXU matmul: K = 3*W*C (three dh row windows
        # concatenated on the lane axis); the banded bf16 weight encodes the dw
        # shifts, horizontal zero padding and the folded BN scale.
        pad_ref[1:H + 1, :] = act
        patches = jnp.concatenate(
            [pad_ref[0:H, :], pad_ref[1:H + 1, :], pad_ref[2:H + 2, :]],
            axis=1).astype(w_ref.dtype)                                  # (H, 3*W*C)
        y = jnp.dot(patches, w_ref[...], preferred_element_type=jnp.float32)
        return y + b_ref[...]                                            # (H, W*C) f32

    act = x_ref[0].astype(jnp.float32)                                   # (H, W*C)

    i = 0
    for has_down in block_has_down:
        w1_ref, b1_ref, w2_ref, b2_ref, dct_ref, fw1_ref, fw2_ref = param_refs[i:i + 7]
        i += 7
        if has_down:
            wd_ref, bd_ref = param_refs[i:i + 2]
            i += 2

        # conv1 + folded BN + ReLU, conv2 + folded BN
        y1 = jnp.maximum(conv3x3_bn(act, w1_ref, b1_ref), 0.0)
        y2 = conv3x3_bn(y1, w2_ref, b2_ref)

        # Multi-spectral (DCT) channel attention, kept off the MXU:
        # per-(w, channel) partial pools via a sublane reduce; the remaining
        # "sum over w" is folded into the tiled FC1 rows; FC2 rows are tiled
        # over w so the sigmoid output is already the lane-dense (1, W*C) scale.
        pooled = jnp.sum(y2 * dct_ref[...], axis=0, keepdims=True)        # (1, W*C)
        n_red = fw1_ref.shape[0]
        z = jnp.zeros((1, WC), jnp.float32)
        for r in range(n_red):
            h_r = jnp.maximum(
                jnp.sum(pooled * fw1_ref[r:r + 1, :], axis=1, keepdims=True), 0.0)  # (1, 1)
            z = z + h_r * fw2_ref[r:r + 1, :]
        att = pl.reciprocal(1.0 + jnp.exp(-z), approx=True)               # sigmoid (EUP)

        # Residual branch: block-diagonal 1x1 conv + folded BN when channel
        # counts differ, identity otherwise.
        if has_down:
            res = jnp.dot(act.astype(wd_ref.dtype), wd_ref[...],
                          preferred_element_type=jnp.float32) + bd_ref[...]
        else:
            res = act

        act = jnp.maximum(y2 * att + res, 0.0)                            # (H, W*C)

    o_ref[0] = act.astype(o_ref.dtype)


# ----------------------------------------------------------------------------
# Wrapper: one pallas_call for the whole network, grid over batch.
# ----------------------------------------------------------------------------
def fcanet_forward(x_nchw, block_params, *, H, W, C):
    N, cin = x_nchw.shape[0], x_nchw.shape[1]
    WC = W * C

    # NCHW -> lane-dense (N, H, W*C).  Input channels are zero-padded up to C;
    # the padded channels hit zero rows in the packed weights, so the result is
    # unchanged (layout plumbing only, done once outside the kernel).
    x = jnp.transpose(x_nchw, (0, 2, 3, 1))
    if cin < C:
        x = jnp.pad(x, ((0, 0), (0, 0), (0, 0), (0, C - cin)))
    x = x.reshape(N, H, WC)

    args = [x]
    in_specs = [pl.BlockSpec((1, H, WC), lambda n: (n, 0, 0))]
    block_has_down = []
    for p in block_params:
        names = ["w1", "b1", "w2", "b2", "dct", "fw1", "fw2"]
        has_down = "wd" in p
        if has_down:
            names += ["wd", "bd"]
        block_has_down.append(has_down)
        for name in names:
            arr = p[name]
            args.append(arr)
            in_specs.append(pl.BlockSpec(arr.shape, lambda n: (0, 0)))

    kernel = functools.partial(_fcanet_kernel,
                               block_has_down=tuple(block_has_down),
                               H=H, W=W, C=C)

    out = pl.pallas_call(
        kernel,
        out_shape=jax.ShapeDtypeStruct((N, H, WC), x.dtype),
        grid=(N,),
        in_specs=in_specs,
        out_specs=pl.BlockSpec((1, H, WC), lambda n: (n, 0, 0)),
        scratch_shapes=[pltpu.VMEM((H + 2, WC), jnp.float32)],   # zero-halo padded image
        compiler_params=pltpu.CompilerParams(
            dimension_semantics=("parallel",),
            vmem_limit_bytes=32 * 1024 * 1024,
        ),
    )(*args)

    out = out.reshape(N, H, W, C)
    return jnp.transpose(out, (0, 3, 1, 2))


# ----------------------------------------------------------------------------
# Parameter construction (deterministic, synthetic; BN folded, weights packed
# host-side into the banded / lane-dense layouts consumed by the kernel).
# ----------------------------------------------------------------------------
def _build_dct_filters(H, W, C):
    """FcaNet multi-spectral DCT filters (first 4 'top16' freqs), lane-dense (H, W*C)."""
    mapper_x = [0, 0, 6, 0]
    mapper_y = [0, 1, 0, 5]
    n_freq = len(mapper_x)
    assert C % n_freq == 0, "channels must be divisible by number of frequencies"
    sx, sy = max(H // 7, 1), max(W // 7, 1)
    mapper_x = [u * sx for u in mapper_x]
    mapper_y = [v * sy for v in mapper_y]
    c_part = C // n_freq

    def b1d(pos, freq, L):
        r = math.cos(math.pi * freq * (pos + 0.5) / L) / math.sqrt(L)
        return r if freq == 0 else r * math.sqrt(2)

    filt = np.zeros((H, W, C), np.float32)
    for i, (u, v) in enumerate(zip(mapper_x, mapper_y)):
        for h in range(H):
            for w in range(W):
                filt[h, w, i * c_part:(i + 1) * c_part] = b1d(h, u, H) * b1d(w, v, W)
    return jnp.asarray(filt.reshape(H, W * C))


def _fold_bn(key, c, eps=1e-5):
    k1, k2, k3, k4 = jax.random.split(key, 4)
    gamma = 1.0 + 0.1 * jax.random.normal(k1, (c,), jnp.float32)
    beta = 0.1 * jax.random.normal(k2, (c,), jnp.float32)
    mean = 0.05 * jax.random.normal(k3, (c,), jnp.float32)
    var = 1.0 + 0.1 * jnp.abs(jax.random.normal(k4, (c,), jnp.float32))
    scale = gamma / jnp.sqrt(var + eps)
    bias = beta - mean * scale
    return np.asarray(scale), np.asarray(bias)


def _pack_conv3x3_banded(w, bn_scale, W, C):
    """(3,3,cin,cout)*bn_scale -> banded (3*W*C, W*cout) bf16.

    Row dh*W*C + wi*C + c, column wo*cout + co holds w[dh, wi-wo+1, c, co] when
    |wi-wo| <= 1 (else 0), so a single (H, 3*W*C) x (3*W*C, W*cout) matmul does
    the full 3x3 conv (horizontal shifts + zero padding included) directly in
    the lane-dense activation layout.  Input channels beyond cin map to zero rows.
    """
    kh, kw, cin, cout = w.shape
    wf = np.asarray(w, np.float32) * np.asarray(bn_scale, np.float32).reshape(1, 1, 1, cout)
    wp = np.zeros((3, 3, C, cout), np.float32)
    wp[:, :, :cin, :] = wf
    M = np.zeros((3, W * C, W * cout), np.float32)
    for dh in range(3):
        for wo in range(W):
            for dw in range(3):
                wi = wo + dw - 1
                if 0 <= wi < W:
                    M[dh, wi * C:(wi + 1) * C, wo * cout:(wo + 1) * cout] = wp[dh, dw]
    return jnp.asarray(M.reshape(3 * W * C, W * cout), dtype=jnp.bfloat16)


def _pack_conv1x1_blockdiag(wd, bn_scale, W, C):
    """(cin,cout)*bn_scale -> block-diagonal (W*C, W*cout) bf16 shortcut weight."""
    cin, cout = wd.shape
    wf = np.asarray(wd, np.float32) * np.asarray(bn_scale, np.float32).reshape(1, cout)
    wp = np.zeros((C, cout), np.float32)
    wp[:cin, :] = wf
    M = np.zeros((W * C, W * cout), np.float32)
    for w in range(W):
        M[w * C:(w + 1) * C, w * cout:(w + 1) * cout] = wp
    return jnp.asarray(M, dtype=jnp.bfloat16)


def init_block_params(key, cin, cout, H, W, reduction):
    keys = jax.random.split(key, 8)
    cr = max(cout // reduction, 1)
    C = cout
    w1 = jax.random.normal(keys[0], (3, 3, cin, cout), jnp.float32) / math.sqrt(9 * cin)
    s1, b1 = _fold_bn(keys[1], cout)
    w2 = jax.random.normal(keys[2], (3, 3, cout, cout), jnp.float32) / math.sqrt(9 * cout)
    s2, b2 = _fold_bn(keys[3], cout)
    fw1 = np.asarray(jax.random.normal(keys[4], (cout, cr), jnp.float32)) / math.sqrt(cout)
    fw2 = np.asarray(jax.random.normal(keys[5], (cr, cout), jnp.float32)) / math.sqrt(cr)
    p = {
        "w1": _pack_conv3x3_banded(w1, s1, W, C),
        "b1": jnp.asarray(np.tile(b1, W)[None, :]),            # (1, W*cout) lane-dense
        "w2": _pack_conv3x3_banded(w2, s2, W, C),
        "b2": jnp.asarray(np.tile(b2, W)[None, :]),
        "dct": _build_dct_filters(H, W, cout),                  # (H, W*cout) lane-dense
        "fw1": jnp.asarray(np.tile(fw1.T, (1, W))),             # (cr, W*cout): FC1, sum-over-w folded in
        "fw2": jnp.asarray(np.tile(fw2, (1, W))),               # (cr, W*cout): FC2, tiled over w
    }
    if cin != cout:
        wd = np.asarray(jax.random.normal(keys[6], (cin, cout), jnp.float32)) / math.sqrt(cin)
        sd, bd = _fold_bn(keys[7], cout)
        p["wd"] = _pack_conv1x1_blockdiag(wd, sd, W, C)
        p["bd"] = jnp.asarray(np.tile(bd, W)[None, :])
    return p


# ----------------------------------------------------------------------------
# Model
# ----------------------------------------------------------------------------
class FcaNetPallas:
    """Pallas port of FcaNet: a Sequential of FcaBasicBlock(in_ch, out_ch),
    all blocks fused into one pallas_call (eval-mode BN folded into the convs)."""

    def __init__(self, in_channels, out_channels, blocks, H, W, reduction=4, seed=0):
        assert in_channels <= out_channels, "lane-dense layout assumes in_channels <= out_channels"
        key = jax.random.PRNGKey(seed)
        self.block_params = []
        cin = in_channels
        for _ in range(blocks):
            key, sub = jax.random.split(key)
            self.block_params.append(init_block_params(sub, cin, out_channels, H, W, reduction))
            cin = out_channels
        self._fwd = jax.jit(functools.partial(fcanet_forward, H=H, W=W, C=out_channels))

    def __call__(self, x_nchw):
        return self._fwd(x_nchw, self.block_params)


if __name__ == "__main__":
    key = jax.random.PRNGKey(0)
    # PyTorch-style NCHW input: batch=2, in_channels=4, 16x16 spatial
    x = jax.random.normal(key, (2, 4, 16, 16), jnp.float32)

    model = FcaNetPallas(in_channels=4, out_channels=8, blocks=2, H=16, W=16, reduction=4)
    y = jax.block_until_ready(model(x))
    assert y.shape == (2, 8, 16, 16)
    assert bool(jnp.all(jnp.isfinite(y)))
    print("KERNEL_OK")
</pallas_src>

<mosaic_0001>
module attributes {stable_mosaic.version = 11 : i64} {
  func.func @_fcanet_kernel(%arg0: i32, %arg1: memref<1x16x128xf32, #tpu.memory_space<vmem>>, %arg2: memref<384x128xbf16, #tpu.memory_space<vmem>>, %arg3: memref<1x128xf32, #tpu.memory_space<vmem>>, %arg4: memref<384x128xbf16, #tpu.memory_space<vmem>>, %arg5: memref<1x128xf32, #tpu.memory_space<vmem>>, %arg6: memref<16x128xf32, #tpu.memory_space<vmem>>, %arg7: memref<2x128xf32, #tpu.memory_space<vmem>>, %arg8: memref<2x128xf32, #tpu.memory_space<vmem>>, %arg9: memref<128x128xbf16, #tpu.memory_space<vmem>>, %arg10: memref<1x128xf32, #tpu.memory_space<vmem>>, %arg11: memref<384x128xbf16, #tpu.memory_space<vmem>>, %arg12: memref<1x128xf32, #tpu.memory_space<vmem>>, %arg13: memref<384x128xbf16, #tpu.memory_space<vmem>>, %arg14: memref<1x128xf32, #tpu.memory_space<vmem>>, %arg15: memref<16x128xf32, #tpu.memory_space<vmem>>, %arg16: memref<2x128xf32, #tpu.memory_space<vmem>>, %arg17: memref<2x128xf32, #tpu.memory_space<vmem>>, %arg18: memref<1x16x128xf32, #tpu.memory_space<vmem>>, %arg19: memref<18x128xf32, #tpu.memory_space<vmem>>) attributes {dimension_semantics = [#tpu.dimension_semantics<parallel>], iteration_bounds = array<i64: 2>, scalar_prefetch = 0 : i64, scratch_operands = 1 : i64, tpu.core_type = #tpu.core_type<tc>, window_params = [{transform_indices = @transform_0, window_bounds = array<i64: 1, 16, 128>}, {pipeline_mode = #tpu.pipeline_mode<synchronous>, transform_indices = @transform_1, window_bounds = array<i64: 384, 128>}, {pipeline_mode = #tpu.pipeline_mode<synchronous>, transform_indices = @transform_2, window_bounds = array<i64: 1, 128>}, {pipeline_mode = #tpu.pipeline_mode<synchronous>, transform_indices = @transform_3, window_bounds = array<i64: 384, 128>}, {pipeline_mode = #tpu.pipeline_mode<synchronous>, transform_indices = @transform_4, window_bounds = array<i64: 1, 128>}, {pipeline_mode = #tpu.pipeline_mode<synchronous>, transform_indices = @transform_5, window_bounds = array<i64: 16, 128>}, {pipeline_mode = #tpu.pipeline_mode<synchronous>, transform_indices = @transform_6, window_bounds = array<i64: 2, 128>}, {pipeline_mode = #tpu.pipeline_mode<synchronous>, transform_indices = @transform_7, window_bounds = array<i64: 2, 128>}, {pipeline_mode = #tpu.pipeline_mode<synchronous>, transform_indices = @transform_8, window_bounds = array<i64: 128, 128>}, {pipeline_mode = #tpu.pipeline_mode<synchronous>, transform_indices = @transform_9, window_bounds = array<i64: 1, 128>}, {pipeline_mode = #tpu.pipeline_mode<synchronous>, transform_indices = @transform_10, window_bounds = array<i64: 384, 128>}, {pipeline_mode = #tpu.pipeline_mode<synchronous>, transform_indices = @transform_11, window_bounds = array<i64: 1, 128>}, {pipeline_mode = #tpu.pipeline_mode<synchronous>, transform_indices = @transform_12, window_bounds = array<i64: 384, 128>}, {pipeline_mode = #tpu.pipeline_mode<synchronous>, transform_indices = @transform_13, window_bounds = array<i64: 1, 128>}, {pipeline_mode = #tpu.pipeline_mode<synchronous>, transform_indices = @transform_14, window_bounds = array<i64: 16, 128>}, {pipeline_mode = #tpu.pipeline_mode<synchronous>, transform_indices = @transform_15, window_bounds = array<i64: 2, 128>}, {pipeline_mode = #tpu.pipeline_mode<synchronous>, transform_indices = @transform_16, window_bounds = array<i64: 2, 128>}, {transform_indices = @transform_17, window_bounds = array<i64: 1, 16, 128>}]} {
    %cst = arith.constant 0.000000e+00 : f32
    %0 = vector.broadcast %cst : f32 to vector<1x128xf32>
    %c0 = arith.constant 0 : index
    %c0_0 = arith.constant 0 : index
    %1 = vector.load %arg19[%c0, %c0_0] : memref<18x128xf32, #tpu.memory_space<vmem>>, vector<1x128xf32>
    tpu.vector_store %arg19[%c0, %c0_0], %0 {strides = array<i32>} : memref<18x128xf32, #tpu.memory_space<vmem>>, vector<1x128xf32>,
    %c17 = arith.constant 17 : index
    %c0_1 = arith.constant 0 : index
    %2 = vector.load %arg19[%c17, %c0_1] : memref<18x128xf32, #tpu.memory_space<vmem>>, vector<1x128xf32>
    tpu.vector_store %arg19[%c17, %c0_1], %0 {strides = array<i32>} : memref<18x128xf32, #tpu.memory_space<vmem>>, vector<1x128xf32>,
    %c0_2 = arith.constant 0 : index
    %c0_3 = arith.constant 0 : index
    %c0_4 = arith.constant 0 : index
    %3 = vector.load %arg1[%c0_2, %c0_3, %c0_4] : memref<1x16x128xf32, #tpu.memory_space<vmem>>, vector<1x16x128xf32>
    %4 = vector.shape_cast %3 : vector<1x16x128xf32> to vector<16x128xf32>
    %c1 = arith.constant 1 : index
    %c0_5 = arith.constant 0 : index
    %5 = vector.load %arg19[%c1, %c0_5] : memref<18x128xf32, #tpu.memory_space<vmem>>, vector<16x128xf32>
    tpu.vector_store %arg19[%c1, %c0_5], %4 {strides = array<i32>} : memref<18x128xf32, #tpu.memory_space<vmem>>, vector<16x128xf32>,
    %c0_6 = arith.constant 0 : index
    %c0_7 = arith.constant 0 : index
    %6 = vector.load %arg19[%c0_6, %c0_7] : memref<18x128xf32, #tpu.memory_space<vmem>>, vector<16x128xf32>
    %c1_8 = arith.constant 1 : index
    %c0_9 = arith.constant 0 : index
    %7 = vector.load %arg19[%c1_8, %c0_9] : memref<18x128xf32, #tpu.memory_space<vmem>>, vector<16x128xf32>
    %c2 = arith.constant 2 : index
    %c0_10 = arith.constant 0 : index
    %8 = vector.load %arg19[%c2, %c0_10] : memref<18x128xf32, #tpu.memory_space<vmem>>, vector<16x128xf32>
    %9 = tpu.concatenate %6, %7, %8 in 1 : vector<16x128xf32>, vector<16x128xf32>, vector<16x128xf32> -> vector<16x384xf32>
    %10 = arith.truncf %9 : vector<16x384xf32> to vector<16x384xbf16>
    %c0_11 = arith.constant 0 : index
    %c0_12 = arith.constant 0 : index
    %11 = vector.load %arg2[%c0_11, %c0_12] : memref<384x128xbf16, #tpu.memory_space<vmem>>, vector<384x128xbf16>
    %cst_13 = arith.constant dense<0.000000e+00> : vector<16x128xf32>
    %12 = tpu.matmul %10, %11, %cst_13 {dimension_numbers = #tpu.dot_dimension_numbers<[1], [0], [0], [1], [0, 0, 1, 1], [], []>} : vector<16x384xbf16>, vector<384x128xbf16>, vector<16x128xf32> -> vector<16x128xf32>
    %c0_14 = arith.constant 0 : index
    %c0_15 = arith.constant 0 : index
    %13 = vector.load %arg3[%c0_14, %c0_15] : memref<1x128xf32, #tpu.memory_space<vmem>>, vector<1x128xf32>
    %14 = vector.broadcast %13 : vector<1x128xf32> to vector<16x128xf32>
    %15 = arith.addf %12, %14 : vector<16x128xf32>
    %cst_16 = arith.constant 0.000000e+00 : f32
    %16 = vector.broadcast %cst_16 : f32 to vector<16x128xf32>
    %17 = arith.maximumf %15, %16 : vector<16x128xf32>
    %c1_17 = arith.constant 1 : index
    %c0_18 = arith.constant 0 : index
    %18 = vector.load %arg19[%c1_17, %c0_18] : memref<18x128xf32, #tpu.memory_space<vmem>>, vector<16x128xf32>
    tpu.vector_store %arg19[%c1_17, %c0_18], %17 {strides = array<i32>} : memref<18x128xf32, #tpu.memory_space<vmem>>, vector<16x128xf32>,
    %c0_19 = arith.constant 0 : index
    %c0_20 = arith.constant 0 : index
    %19 = vector.load %arg19[%c0_19, %c0_20] : memref<18x128xf32, #tpu.memory_space<vmem>>, vector<16x128xf32>
    %c1_21 = arith.constant 1 : index
    %c0_22 = arith.constant 0 : index
    %20 = vector.load %arg19[%c1_21, %c0_22] : memref<18x128xf32, #tpu.memory_space<vmem>>, vector<16x128xf32>
    %c2_23 = arith.constant 2 : index
    %c0_24 = arith.constant 0 : index
    %21 = vector.load %arg19[%c2_23, %c0_24] : memref<18x128xf32, #tpu.memory_space<vmem>>, vector<16x128xf32>
    %22 = tpu.concatenate %19, %20, %21 in 1 : vector<16x128xf32>, vector<16x128xf32>, vector<16x128xf32> -> vector<16x384xf32>
    %23 = arith.truncf %22 : vector<16x384xf32> to vector<16x384xbf16>
    %c0_25 = arith.constant 0 : index
    %c0_26 = arith.constant 0 : index
    %24 = vector.load %arg4[%c0_25, %c0_26] : memref<384x128xbf16, #tpu.memory_space<vmem>>, vector<384x128xbf16>
    %cst_27 = arith.constant dense<0.000000e+00> : vector<16x128xf32>
    %25 = tpu.matmul %23, %24, %cst_27 {dimension_numbers = #tpu.dot_dimension_numbers<[1], [0], [0], [1], [0, 0, 1, 1], [], []>} : vector<16x384xbf16>, vector<384x128xbf16>, vector<16x128xf32> -> vector<16x128xf32>
    %c0_28 = arith.constant 0 : index
    %c0_29 = arith.constant 0 : index
    %26 = vector.load %arg5[%c0_28, %c0_29] : memref<1x128xf32, #tpu.memory_space<vmem>>, vector<1x128xf32>
    %27 = vector.broadcast %26 : vector<1x128xf32> to vector<16x128xf32>
    %28 = arith.addf %25, %27 : vector<16x128xf32>
    %c0_30 = arith.constant 0 : index
    %c0_31 = arith.constant 0 : index
    %29 = vector.load %arg6[%c0_30, %c0_31] : memref<16x128xf32, #tpu.memory_space<vmem>>, vector<16x128xf32>
    %30 = arith.mulf %28, %29 : vector<16x128xf32>
    %cst_32 = arith.constant dense<0.000000e+00> : vector<128xf32>
    %31 = vector.multi_reduction <add>, %30, %cst_32 [0] : vector<16x128xf32> to vector<128xf32>
    %32 = vector.shape_cast %31 : vector<128xf32> to vector<1x128xf32>
    %cst_33 = arith.constant 0.000000e+00 : f32
    %33 = vector.broadcast %cst_33 : f32 to vector<1x128xf32>
    %c0_34 = arith.constant 0 : index
    %c0_35 = arith.constant 0 : index
    %34 = vector.load %arg7[%c0_34, %c0_35] : memref<2x128xf32, #tpu.memory_space<vmem>>, vector<1x128xf32>
    %35 = arith.mulf %32, %34 : vector<1x128xf32>
    %cst_36 = arith.constant dense<0.000000e+00> : vector<1xf32>
    %36 = vector.multi_reduction <add>, %35, %cst_36 [1] : vector<1x128xf32> to vector<1xf32>
    %37 = vector.shape_cast %36 : vector<1xf32> to vector<1x1xf32>
    %cst_37 = arith.constant 0.000000e+00 : f32
    %38 = vector.broadcast %cst_37 : f32 to vector<1x1xf32>
    %39 = arith.maximumf %37, %38 : vector<1x1xf32>
    %c0_38 = arith.constant 0 : index
    %c0_39 = arith.constant 0 : index
    %40 = vector.load %arg8[%c0_38, %c0_39] : memref<2x128xf32, #tpu.memory_space<vmem>>, vector<1x128xf32>
    %41 = vector.broadcast %39 : vector<1x1xf32> to vector<1x128xf32>
    %42 = arith.mulf %41, %40 : vector<1x128xf32>
    %43 = arith.addf %33, %42 : vector<1x128xf32>
    %c1_40 = arith.constant 1 : index
    %c0_41 = arith.constant 0 : index
    %44 = vector.load %arg7[%c1_40, %c0_41] : memref<2x128xf32, #tpu.memory_space<vmem>>, vector<1x128xf32>
    %45 = arith.mulf %32, %44 : vector<1x128xf32>
    %cst_42 = arith.constant dense<0.000000e+00> : vector<1xf32>
    %46 = vector.multi_reduction <add>, %45, %cst_42 [1] : vector<1x128xf32> to vector<1xf32>
    %47 = vector.shape_cast %46 : vector<1xf32> to vector<1x1xf32>
    %cst_43 = arith.constant 0.000000e+00 : f32
    %48 = vector.broadcast %cst_43 : f32 to vector<1x1xf32>
    %49 = arith.maximumf %47, %48 : vector<1x1xf32>
    %c1_44 = arith.constant 1 : index
    %c0_45 = arith.constant 0 : index
    %50 = vector.load %arg8[%c1_44, %c0_45] : memref<2x128xf32, #tpu.memory_space<vmem>>, vector<1x128xf32>
    %51 = vector.broadcast %49 : vector<1x1xf32> to vector<1x128xf32>
    %52 = arith.mulf %51, %50 : vector<1x128xf32>
    %53 = arith.addf %43, %52 : vector<1x128xf32>
    %cst_46 = arith.constant 0.000000e+00 : f32
    %54 = vector.broadcast %cst_46 : f32 to vector<1x128xf32>
    %55 = arith.subf %54, %53 : vector<1x128xf32>
    %56 = math.exp %55 : vector<1x128xf32>
    %cst_47 = arith.constant 1.000000e+00 : f32
    %57 = vector.broadcast %cst_47 : f32 to vector<1x128xf32>
    %58 = arith.addf %57, %56 : vector<1x128xf32>
    %59 = tpu.reciprocal %58 {approx = true} : vector<1x128xf32> -> vector<1x128xf32>
    %60 = arith.truncf %4 : vector<16x128xf32> to vector<16x128xbf16>
    %c0_48 = arith.constant 0 : index
    %c0_49 = arith.constant 0 : index
    %61 = vector.load %arg9[%c0_48, %c0_49] : memref<128x128xbf16, #tpu.memory_space<vmem>>, vector<128x128xbf16>
    %cst_50 = arith.constant dense<0.000000e+00> : vector<16x128xf32>
    %62 = tpu.matmul %60, %61, %cst_50 {dimension_numbers = #tpu.dot_dimension_numbers<[1], [0], [0], [1], [0, 0, 1, 1], [], []>} : vector<16x128xbf16>, vector<128x128xbf16>, vector<16x128xf32> -> vector<16x128xf32>
    %c0_51 = arith.constant 0 : index
    %c0_52 = arith.constant 0 : index
    %63 = vector.load %arg10[%c0_51, %c0_52] : memref<1x128xf32, #tpu.memory_space<vmem>>, vector<1x128xf32>
    %64 = vector.broadcast %63 : vector<1x128xf32> to vector<16x128xf32>
    %65 = arith.addf %62, %64 : vector<16x128xf32>
    %66 = vector.broadcast %59 : vector<1x128xf32> to vector<16x128xf32>
    %67 = arith.mulf %28, %66 : vector<16x128xf32>
    %68 = arith.addf %67, %65 : vector<16x128xf32>
    %cst_53 = arith.constant 0.000000e+00 : f32
    %69 = vector.broadcast %cst_53 : f32 to vector<16x128xf32>
    %70 = arith.maximumf %68, %69 : vector<16x128xf32>
    %c1_54 = arith.constant 1 : index
    %c0_55 = arith.constant 0 : index
    %71 = vector.load %arg19[%c1_54, %c0_55] : memref<18x128xf32, #tpu.memory_space<vmem>>, vector<16x128xf32>
    tpu.vector_store %arg19[%c1_54, %c0_55], %70 {strides = array<i32>} : memref<18x128xf32, #tpu.memory_space<vmem>>, vector<16x128xf32>,
    %c0_56 = arith.constant 0 : index
    %c0_57 = arith.constant 0 : index
    %72 = vector.load %arg19[%c0_56, %c0_57] : memref<18x128xf32, #tpu.memory_space<vmem>>, vector<16x128xf32>
    %c1_58 = arith.constant 1 : index
    %c0_59 = arith.constant 0 : index
    %73 = vector.load %arg19[%c1_58, %c0_59] : memref<18x128xf32, #tpu.memory_space<vmem>>, vector<16x128xf32>
    %c2_60 = arith.constant 2 : index
    %c0_61 = arith.constant 0 : index
    %74 = vector.load %arg19[%c2_60, %c0_61] : memref<18x128xf32, #tpu.memory_space<vmem>>, vector<16x128xf32>
    %75 = tpu.concatenate %72, %73, %74 in 1 : vector<16x128xf32>, vector<16x128xf32>, vector<16x128xf32> -> vector<16x384xf32>
    %76 = arith.truncf %75 : vector<16x384xf32> to vector<16x384xbf16>
    %c0_62 = arith.constant 0 : index
    %c0_63 = arith.constant 0 : index
    %77 = vector.load %arg11[%c0_62, %c0_63] : memref<384x128xbf16, #tpu.memory_space<vmem>>, vector<384x128xbf16>
    %cst_64 = arith.constant dense<0.000000e+00> : vector<16x128xf32>
    %78 = tpu.matmul %76, %77, %cst_64 {dimension_numbers = #tpu.dot_dimension_numbers<[1], [0], [0], [1], [0, 0, 1, 1], [], []>} : vector<16x384xbf16>, vector<384x128xbf16>, vector<16x128xf32> -> vector<16x128xf32>
    %c0_65 = arith.constant 0 : index
    %c0_66 = arith.constant 0 : index
    %79 = vector.load %arg12[%c0_65, %c0_66] : memref<1x128xf32, #tpu.memory_space<vmem>>, vector<1x128xf32>
    %80 = vector.broadcast %79 : vector<1x128xf32> to vector<16x128xf32>
    %81 = arith.addf %78, %80 : vector<16x128xf32>
    %cst_67 = arith.constant 0.000000e+00 : f32
    %82 = vector.broadcast %cst_67 : f32 to vector<16x128xf32>
    %83 = arith.maximumf %81, %82 : vector<16x128xf32>
    %c1_68 = arith.constant 1 : index
    %c0_69 = arith.constant 0 : index
    %84 = vector.load %arg19[%c1_68, %c0_69] : memref<18x128xf32, #tpu.memory_space<vmem>>, vector<16x128xf32>
    tpu.vector_store %arg19[%c1_68, %c0_69], %83 {strides = array<i32>} : memref<18x128xf32, #tpu.memory_space<vmem>>, vector<16x128xf32>,
    %c0_70 = arith.constant 0 : index
    %c0_71 = arith.constant 0 : index
    %85 = vector.load %arg19[%c0_70, %c0_71] : memref<18x128xf32, #tpu.memory_space<vmem>>, vector<16x128xf32>
    %c1_72 = arith.constant 1 : index
    %c0_73 = arith.constant 0 : index
    %86 = vector.load %arg19[%c1_72, %c0_73] : memref<18x128xf32, #tpu.memory_space<vmem>>, vector<16x128xf32>
    %c2_74 = arith.constant 2 : index
    %c0_75 = arith.constant 0 : index
    %87 = vector.load %arg19[%c2_74, %c0_75] : memref<18x128xf32, #tpu.memory_space<vmem>>, vector<16x128xf32>
    %88 = tpu.concatenate %85, %86, %87 in 1 : vector<16x128xf32>, vector<16x128xf32>, vector<16x128xf32> -> vector<16x384xf32>
    %89 = arith.truncf %88 : vector<16x384xf32> to vector<16x384xbf16>
    %c0_76 = arith.constant 0 : index
    %c0_77 = arith.constant 0 : index
    %90 = vector.load %arg13[%c0_76, %c0_77] : memref<384x128xbf16, #tpu.memory_space<vmem>>, vector<384x128xbf16>
    %cst_78 = arith.constant dense<0.000000e+00> : vector<16x128xf32>
    %91 = tpu.matmul %89, %90, %cst_78 {dimension_numbers = #tpu.dot_dimension_numbers<[1], [0], [0], [1], [0, 0, 1, 1], [], []>} : vector<16x384xbf16>, vector<384x128xbf16>, vector<16x128xf32> -> vector<16x128xf32>
    %c0_79 = arith.constant 0 : index
    %c0_80 = arith.constant 0 : index
    %92 = vector.load %arg14[%c0_79, %c0_80] : memref<1x128xf32, #tpu.memory_space<vmem>>, vector<1x128xf32>
    %93 = vector.broadcast %92 : vector<1x128xf32> to vector<16x128xf32>
    %94 = arith.addf %91, %93 : vector<16x128xf32>
    %c0_81 = arith.constant 0 : index
    %c0_82 = arith.constant 0 : index
    %95 = vector.load %arg15[%c0_81, %c0_82] : memref<16x128xf32, #tpu.memory_space<vmem>>, vector<16x128xf32>
    %96 = arith.mulf %94, %95 : vector<16x128xf32>
    %cst_83 = arith.constant dense<0.000000e+00> : vector<128xf32>
    %97 = vector.multi_reduction <add>, %96, %cst_83 [0] : vector<16x128xf32> to vector<128xf32>
    %98 = vector.shape_cast %97 : vector<128xf32> to vector<1x128xf32>
    %cst_84 = arith.constant 0.000000e+00 : f32
    %99 = vector.broadcast %cst_84 : f32 to vector<1x128xf32>
    %c0_85 = arith.constant 0 : index
    %c0_86 = arith.constant 0 : index
    %100 = vector.load %arg16[%c0_85, %c0_86] : memref<2x128xf32, #tpu.memory_space<vmem>>, vector<1x128xf32>
    %101 = arith.mulf %98, %100 : vector<1x128xf32>
    %cst_87 = arith.constant dense<0.000000e+00> : vector<1xf32>
    %102 = vector.multi_reduction <add>, %101, %cst_87 [1] : vector<1x128xf32> to vector<1xf32>
    %103 = vector.shape_cast %102 : vector<1xf32> to vector<1x1xf32>
    %cst_88 = arith.constant 0.000000e+00 : f32
    %104 = vector.broadcast %cst_88 : f32 to vector<1x1xf32>
    %105 = arith.maximumf %103, %104 : vector<1x1xf32>
    %c0_89 = arith.constant 0 : index
    %c0_90 = arith.constant 0 : index
    %106 = vector.load %arg17[%c0_89, %c0_90] : memref<2x128xf32, #tpu.memory_space<vmem>>, vector<1x128xf32>
    %107 = vector.broadcast %105 : vector<1x1xf32> to vector<1x128xf32>
    %108 = arith.mulf %107, %106 : vector<1x128xf32>
    %109 = arith.addf %99, %108 : vector<1x128xf32>
    %c1_91 = arith.constant 1 : index
    %c0_92 = arith.constant 0 : index
    %110 = vector.load %arg16[%c1_91, %c0_92] : memref<2x128xf32, #tpu.memory_space<vmem>>, vector<1x128xf32>
    %111 = arith.mulf %98, %110 : vector<1x128xf32>
    %cst_93 = arith.constant dense<0.000000e+00> : vector<1xf32>
    %112 = vector.multi_reduction <add>, %111, %cst_93 [1] : vector<1x128xf32> to vector<1xf32>
    %113 = vector.shape_cast %112 : vector<1xf32> to vector<1x1xf32>
    %cst_94 = arith.constant 0.000000e+00 : f32
    %114 = vector.broadcast %cst_94 : f32 to vector<1x1xf32>
    %115 = arith.maximumf %113, %114 : vector<1x1xf32>
    %c1_95 = arith.constant 1 : index
    %c0_96 = arith.constant 0 : index
    %116 = vector.load %arg17[%c1_95, %c0_96] : memref<2x128xf32, #tpu.memory_space<vmem>>, vector<1x128xf32>
    %117 = vector.broadcast %115 : vector<1x1xf32> to vector<1x128xf32>
    %118 = arith.mulf %117, %116 : vector<1x128xf32>
    %119 = arith.addf %109, %118 : vector<1x128xf32>
    %cst_97 = arith.constant 0.000000e+00 : f32
    %120 = vector.broadcast %cst_97 : f32 to vector<1x128xf32>
    %121 = arith.subf %120, %119 : vector<1x128xf32>
    %122 = math.exp %121 : vector<1x128xf32>
    %cst_98 = arith.constant 1.000000e+00 : f32
    %123 = vector.broadcast %cst_98 : f32 to vector<1x128xf32>
    %124 = arith.addf %123, %122 : vector<1x128xf32>
    %125 = tpu.reciprocal %124 {approx = true} : vector<1x128xf32> -> vector<1x128xf32>
    %126 = vector.broadcast %125 : vector<1x128xf32> to vector<16x128xf32>
    %127 = arith.mulf %94, %126 : vector<16x128xf32>
    %128 = arith.addf %127, %70 : vector<16x128xf32>
    %cst_99 = arith.constant 0.000000e+00 : f32
    %129 = vector.broadcast %cst_99 : f32 to vector<16x128xf32>
    %130 = arith.maximumf %128, %129 : vector<16x128xf32>
    %c0_100 = arith.constant 0 : index
    %c0_101 = arith.constant 0 : index
    %c0_102 = arith.constant 0 : index
    %131 = vector.load %arg18[%c0_100, %c0_101, %c0_102] : memref<1x16x128xf32, #tpu.memory_space<vmem>>, vector<1x16x128xf32>
    %132 = vector.shape_cast %131 : vector<1x16x128xf32> to vector<16x128xf32>
    %133 = vector.shape_cast %130 : vector<16x128xf32> to vector<1x16x128xf32>
    tpu.vector_store %arg18[%c0_100, %c0_101, %c0_102], %133 {strides = array<i32>} : memref<1x16x128xf32, #tpu.memory_space<vmem>>, vector<1x16x128xf32>,
    return
  }
  func.func @transform_0(%arg0: i32) -> (i32, i32, i32) {
    %c0_i32 = arith.constant 0 : i32
    %c0_i32_0 = arith.constant 0 : i32
    %c0_i32_1 = arith.constant 0 : i32
    return %arg0, %c0_i32, %c0_i32_0 : i32, i32, i32
  }
  func.func @transform_1(%arg0: i32) -> (i32, i32) {
    %c0_i32 = arith.constant 0 : i32
    %c0_i32_0 = arith.constant 0 : i32
    %c0_i32_1 = arith.constant 0 : i32
    return %c0_i32, %c0_i32_0 : i32, i32
  }
  func.func @transform_2(%arg0: i32) -> (i32, i32) {
    %c0_i32 = arith.constant 0 : i32
    %c0_i32_0 = arith.constant 0 : i32
    %c0_i32_1 = arith.constant 0 : i32
    return %c0_i32, %c0_i32_0 : i32, i32
  }
  func.func @transform_3(%arg0: i32) -> (i32, i32) {
    %c0_i32 = arith.constant 0 : i32
    %c0_i32_0 = arith.constant 0 : i32
    %c0_i32_1 = arith.constant 0 : i32
    return %c0_i32, %c0_i32_0 : i32, i32
  }
  func.func @transform_4(%arg0: i32) -> (i32, i32) {
    %c0_i32 = arith.constant 0 : i32
    %c0_i32_0 = arith.constant 0 : i32
    %c0_i32_1 = arith.constant 0 : i32
    return %c0_i32, %c0_i32_0 : i32, i32
  }
  func.func @transform_5(%arg0: i32) -> (i32, i32) {
    %c0_i32 = arith.constant 0 : i32
    %c0_i32_0 = arith.constant 0 : i32
    %c0_i32_1 = arith.constant 0 : i32
    return %c0_i32, %c0_i32_0 : i32, i32
  }
  func.func @transform_6(%arg0: i32) -> (i32, i32) {
    %c0_i32 = arith.constant 0 : i32
    %c0_i32_0 = arith.constant 0 : i32
    %c0_i32_1 = arith.constant 0 : i32
    return %c0_i32, %c0_i32_0 : i32, i32
  }
  func.func @transform_7(%arg0: i32) -> (i32, i32) {
    %c0_i32 = arith.constant 0 : i32
    %c0_i32_0 = arith.constant 0 : i32
    %c0_i32_1 = arith.constant 0 : i32
    return %c0_i32, %c0_i32_0 : i32, i32
  }
  func.func @transform_8(%arg0: i32) -> (i32, i32) {
    %c0_i32 = arith.constant 0 : i32
    %c0_i32_0 = arith.constant 0 : i32
    %c0_i32_1 = arith.constant 0 : i32
    return %c0_i32, %c0_i32_0 : i32, i32
  }
  func.func @transform_9(%arg0: i32) -> (i32, i32) {
    %c0_i32 = arith.constant 0 : i32
    %c0_i32_0 = arith.constant 0 : i32
    %c0_i32_1 = arith.constant 0 : i32
    return %c0_i32, %c0_i32_0 : i32, i32
  }
  func.func @transform_10(%arg0: i32) -> (i32, i32) {
    %c0_i32 = arith.constant 0 : i32
    %c0_i32_0 = arith.constant 0 : i32
    %c0_i32_1 = arith.constant 0 : i32
    return %c0_i32, %c0_i32_0 : i32, i32
  }
  func.func @transform_11(%arg0: i32) -> (i32, i32) {
    %c0_i32 = arith.constant 0 : i32
    %c0_i32_0 = arith.constant 0 : i32
    %c0_i32_1 = arith.constant 0 : i32
    return %c0_i32, %c0_i32_0 : i32, i32
  }
  func.func @transform_12(%arg0: i32) -> (i32, i32) {
    %c0_i32 = arith.constant 0 : i32
    %c0_i32_0 = arith.constant 0 : i32
    %c0_i32_1 = arith.constant 0 : i32
    return %c0_i32, %c0_i32_0 : i32, i32
  }
  func.func @transform_13(%arg0: i32) -> (i32, i32) {
    %c0_i32 = arith.constant 0 : i32
    %c0_i32_0 = arith.constant 0 : i32
    %c0_i32_1 = arith.constant 0 : i32
    return %c0_i32, %c0_i32_0 : i32, i32
  }
  func.func @transform_14(%arg0: i32) -> (i32, i32) {
    %c0_i32 = arith.constant 0 : i32
    %c0_i32_0 = arith.constant 0 : i32
    %c0_i32_1 = arith.constant 0 : i32
    return %c0_i32, %c0_i32_0 : i32, i32
  }
  func.func @transform_15(%arg0: i32) -> (i32, i32) {
    %c0_i32 = arith.constant 0 : i32
    %c0_i32_0 = arith.constant 0 : i32
    %c0_i32_1 = arith.constant 0 : i32
    return %c0_i32, %c0_i32_0 : i32, i32
  }
  func.func @transform_16(%arg0: i32) -> (i32, i32) {
    %c0_i32 = arith.constant 0 : i32
    %c0_i32_0 = arith.constant 0 : i32
    %c0_i32_1 = arith.constant 0 : i32
    return %c0_i32, %c0_i32_0 : i32, i32
  }
  func.func @transform_17(%arg0: i32) -> (i32, i32, i32) {
    %c0_i32 = arith.constant 0 : i32
    %c0_i32_0 = arith.constant 0 : i32
    %c0_i32_1 = arith.constant 0 : i32
    return %arg0, %c0_i32, %c0_i32_0 : i32, i32, i32
  }
}

</mosaic_0001>

<bundles_post_ra>
// kernel: fcanet_forward.1
= control target key start
LH: loop header
LB: loop body
LE: loop exit
PB: predicated region body
PF: predicated region fallthrough
CT: control target
= control target key end

     0   :  { %s2562_s24 = smov 0   ;;  %s3044_s0 = inlined_call_operand.vmem [shape: f32[2,16,128], index: 0, kind: input, shape index: {}]   ;;  %s3045_s1 = inlined_call_operand.vmem [shape: bf16[384,128], index: 1, kind: input, shape index: {}]   ;;  %s3046_s2 = inlined_call_operand.vmem [shape: f32[1,128], index: 2, kind: input, shape index: {}]   ;;  %s3047_s3 = inlined_call_operand.vmem [shape: bf16[384,128], index: 3, kind: input, shape index: {}]   ;;  %s3048_s4 = inlined_call_operand.vmem [shape: f32[1,128], index: 4, kind: input, shape index: {}]   ;;  %s3049_s5 = inlined_call_operand.vmem [shape: f32[16,128], index: 5, kind: input, shape index: {}]   ;;  %s3050_s6 = inlined_call_operand.vmem [shape: f32[2,128], index: 6, kind: input, shape index: {}]   ;;  %s3051_s7 = inlined_call_operand.vmem [shape: f32[2,128], index: 7, kind: input, shape index: {}]   ;;  %s3052_s8 = inlined_call_operand.vmem [shape: bf16[128,128], index: 8, kind: input, shape index: {}]   ;;  %s3053_s9 = inlined_call_operand.vmem [shape: f32[1,128], index: 9, kind: input, shape index: {}]   ;;  %s3054_s10 = inlined_call_operand.vmem [shape: bf16[384,128], index: 10, kind: input, shape index: {}]   ;;  %s3055_s11 = inlined_call_operand.vmem [shape: f32[1,128], index: 11, kind: input, shape index: {}]   ;;  %s3056_s12 = inlined_call_operand.vmem [shape: bf16[384,128], index: 12, kind: input, shape index: {}]   ;;  %s3057_s13 = inlined_call_operand.vmem [shape: f32[1,128], index: 13, kind: input, shape index: {}]   ;;  %s3058_s14 = inlined_call_operand.vmem [shape: f32[16,128], index: 14, kind: input, shape index: {}]   ;;  %s3059_s15 = inlined_call_operand.vmem [shape: f32[2,128], index: 15, kind: input, shape index: {}]   ;;  %s3060_s16 = inlined_call_operand.vmem [shape: f32[2,128], index: 16, kind: input, shape index: {}]   ;;  %s3061_s17 = inlined_call_operand.vmem [shape: f32[2,16,128], index: 17, kind: output, shape index: {}]  }
   0x1   :  { %3064 = sst [smem:[#allocation4_spill]] %s3044_s0 }
   0x2   :  { %3065 = sst [smem:[#allocation5_spill]] %s3045_s1 }
   0x3 LB: > { %3066 = sst [smem:[#allocation3_spill]] %s2468_s24  ;;  %s1985_s25 = sadd.s32 4294967295, %s2468_s24   ;;  %s2468_s24 = sphi %s2562_s24, %s27_s24  }
   0x4   : > { %p1989_p0 = scmp.ge.s32.totalorder %s2468_s24, 1  ;;  %p487_p1 = scmp.lt.s32.totalorder %s2468_s24, 3 }
   0x6   : > { %p488_p2 = pnand %p1989_p0, %p487_p1 }
   0x7   : > { %s3067_s28 = sld [smem:[#allocation5_spill]] (!%p488_p2)  ;;  %p539_p3 = scmp.lt.s32.totalorder (!%p488_p2), %s1985_s25, 1 }
   0x8   : > { %491 = sbr.rel (%p488_p2) target bundleno = 1322 (0x52a), region = 88  ;;  %s3068_s1 = sld [smem:[#allocation4_spill]] (!%p488_p2) }
   0xd   : > { %v2350_v0 = vld [vmem:[%s3067_s28 + $0x78] sm:$0xff]   ;;  %v2470_v1 = vmov 0.0   ;;  %v2353_v4 = vld [vmem:[%s3067_s28 + $0x70] sm:$0xff]   ;;  %vm2471_vm0 = vmmov 0   ;;  %v2356_v7 = vld [vmem:[%s3067_s28 + $0x68] sm:$0xff]   ;;  %s3071_s25 = smov (!%p539_p3, %s1985_s25), 1 }
   0xe   : > { %2240 = vmatprep.subr.bf16.mxu1 %v2470_v1  ;;  %550 = vst [vmem:[#allocation2] sm:$0x1] %v2470_v1  ;;  %551 = vst [vmem:[#allocation2 + $0x11] sm:$0x1] %v2470_v1  ;;  %v2351_v2 = vld [vmem:[%s3067_s28 + $0x38] sm:$0xff]   ;;  %2107 = vmatprep.subr.bf16.mxu0 %v2350_v0  ;;  %v2354_v5 = vld [vmem:[%s3067_s28 + $0x30] sm:$0xff]  }
   0xf   : > { %v2352_v3 = vld [vmem:[%s3067_s28 + $0xb8] sm:$0xff]   ;;  %2108 = vmatpush3.bf16.msra.mxu0 %v2351_v2  ;;  %2256 = vmatprep.mubr.msk.bf16.mxu1 %vm2471_vm0, %v2470_v1  ;;  %v2355_v6 = vld [vmem:[%s3067_s28 + $0xb0] sm:$0xff]   ;;  %v2357_v8 = vld [vmem:[%s3067_s28 + $0x28] sm:$0xff]   ;;  %s2105_s22 = sshll.u32 %s3071_s25, 4  ;;  %vm1153_vm1 = vcmask 1040384  }
  0x10   : > { %2241 = vmatpush3.bf16.msra.mxu1 %v2352_v3  ;;  %2109 = vmatprep.subr.bf16.mxu0 %v2353_v4  ;;  %v2358_v9 = vld [vmem:[%s3067_s28 + $0xa8] sm:$0xff]   ;;  %v2359_v10 = vld [vmem:[%s3067_s28 + $0x60] sm:$0xff]   ;;  %v2362_v13 = vld [vmem:[%s3067_s28 + $0x58] sm:$0xff]   ;;  %s543_s20 = scalar_lea.vmem %s3068_s1, %s2105_s22 }
  0x11   : > { %2242 = vmatprep.subr.bf16.mxu1 %v2470_v1  ;;  %v2360_v11 = vld [vmem:[%s3067_s28 + $0x20] sm:$0xff]   ;;  %v2363_v14 = vld [vmem:[%s3067_s28 + $0x18] sm:$0xff]   ;;  %v2365_v16 = vld [vmem:[%s3067_s28 + $0x50] sm:$0xff]  }
  0x12   : > { %v2361_v12 = vld [vmem:[%s3067_s28 + $0xa0] sm:$0xff]   ;;  %v2364_v15 = vld [vmem:[%s3067_s28 + $0x98] sm:$0xff]   ;;  %v2366_v17 = vld [vmem:[%s3067_s28 + $0x10] sm:$0xff]  }
  0x13   : > { %2110 = vmatpush3.bf16.msra.mxu0 %v2354_v5  ;;  %v2367_v18 = vld [vmem:[%s3067_s28 + $0x90] sm:$0xff]   ;;  %v2368_v19 = vld [vmem:[%s3067_s28 + $0x48] sm:$0xff]   ;;  %v2371_v22 = vld [vmem:[%s3067_s28 + $0x40] sm:$0xff]  }
  0x14   : > { %2243 = vmatpush3.bf16.msra.mxu1 %v2355_v6  ;;  %2111 = vmatprep.subr.bf16.mxu0 %v2356_v7  ;;  %v2369_v20 = vld [vmem:[%s3067_s28 + $0x8] sm:$0xff]   ;;  %v552_v23 = vld [vmem:[%s543_s20] sm:$0xff]  ;;  %v2374_v28 = vld [vmem:[%s3047_s3 + $0x78] sm:$0xff]  }
  0x15   : > { %2244 = vmatprep.subr.bf16.mxu1 %v2470_v1  ;;  %v2370_v21 = vld [vmem:[%s3067_s28 + $0x88] sm:$0xff]   ;;  %554 = vst [vmem:[#allocation2 + $0x1] sm:$0xff] %v552_v23  ;;  %v2372_v26 = vld [vmem:[%s3067_s28] sm:$0xff]   ;;  %v2376_v29 = vld [vmem:[%s3047_s3 + $0x38] sm:$0xff]  }
  0x16   : > { %v553_v24 = vld [vmem:[%s543_s20 + $0x8] sm:$0xff]  ;;  %v2373_v27 = vld [vmem:[%s3067_s28 + $0x80] sm:$0xff]   ;;  %v2375_v30 = vld [vmem:[%s3047_s3 + $0xb8] sm:$0xff]   ;;  %s548_s20 = scalar_lea.vmem %s3061_s17, %s2105_s22 }
  0x17   : > { %2112 = vmatpush3.bf16.msra.mxu0 %v2357_v8  ;;  %555 = vst [vmem:[#allocation2 + $0x9] sm:$0xff] %v553_v24  ;;  %v2659_v25 = vpack.c.bf16 %v553_v24, %v552_v23  ;;  %v2377_v31 = vld [vmem:[%s3047_s3 + $0x70] sm:$0xff]   ;;  %v2380_v40 = vld [vmem:[%s3047_s3 + $0x68] sm:$0xff]   ;;  %v2383_v43 = vld [vmem:[%s3047_s3 + $0x60] sm:$0xff]  }
  0x18   : > { %2245 = vmatpush3.bf16.msra.mxu1 %v2358_v9  ;;  %2113 = vmatprep.subr.bf16.mxu0 %v2359_v10  ;;  %v2379_v38 = vld [vmem:[%s3047_s3 + $0x30] sm:$0xff]   ;;  %v2381_v41 = vld [vmem:[%s3047_s3 + $0xa8] sm:$0xff]   ;;  %v2384_v44 = vld [vmem:[%s3047_s3 + $0xa0] sm:$0xff]  }
  0x19   : > { %2246 = vmatprep.subr.bf16.mxu1 %v2470_v1  ;;  %796 = vmatprep.mubr.bf16.mxu0 %v2659_v25  ;;  %v2378_v39 = vld [vmem:[%s3047_s3 + $0xb0] sm:$0xff]   ;;  %v2382_v42 = vld [vmem:[%s3047_s3 + $0x28] sm:$0xff]   ;;  %v2385_v45 = vld [vmem:[%s3047_s3 + $0x20] sm:$0xff]  }
  0x1a   : > { %v2386_v46 = vld [vmem:[%s3047_s3 + $0x58] sm:$0xff]   ;;  %v2389_v49 = vld [vmem:[%s3047_s3 + $0x50] sm:$0xff]   ;;  %v2392_v52 = vld [vmem:[%s3047_s3 + $0x48] sm:$0xff]  }
  0x1b   : > { %2114 = vmatpush3.bf16.msra.mxu0 %v2360_v11  ;;  %v2387_v47 = vld [vmem:[%s3047_s3 + $0x98] sm:$0xff]   ;;  %v2390_v50 = vld [vmem:[%s3047_s3 + $0x90] sm:$0xff]   ;;  %v2393_v53 = vld [vmem:[%s3047_s3 + $0x88] sm:$0xff]  }
  0x1c   : > { %2247 = vmatpush3.bf16.msra.mxu1 %v2361_v12  ;;  %2115 = vmatprep.subr.bf16.mxu0 %v2362_v13  ;;  %v556_v32 = vld [vmem:[#allocation2] sm:$0xff]  ;;  %v2388_v48 = vld [vmem:[%s3047_s3 + $0x18] sm:$0xff]   ;;  %v2391_v51 = vld [vmem:[%s3047_s3 + $0x10] sm:$0xff]  }
  0x1d   : > { %2248 = vmatprep.subr.bf16.mxu1 %v2470_v1  ;;  %v2394_v54 = vld [vmem:[%s3047_s3 + $0x8] sm:$0xff]   ;;  %v2395_v55 = vld [vmem:[%s3047_s3 + $0x40] sm:$0xff]   ;;  %v2402_v23 = vld [vmem:[%s3052_s8 + $0x18] sm:$0xff]  }
  0x1e   : > { %v557_v33 = vld [vmem:[#allocation2 + $0x8] sm:$0xff]  ;;  %v2396_v56 = vld [vmem:[%s3047_s3 + $0x80] sm:$0xff]   ;;  %v2403_v24 = vld [vmem:[%s3052_s8 + $0x10] sm:$0xff]  }
  0x1f   : > { %2116 = vmatpush3.bf16.msra.mxu0 %v2363_v14  ;;  %v560_v34 = vld [vmem:[#allocation2 + $0x2] sm:$0xff]  ;;  %v562_v35 = vpack.c.bf16 %v557_v33, %v556_v32  ;;  %v561_v36 = vld [vmem:[#allocation2 + $0xa] sm:$0xff]  ;;  %v1994_v60 = vld [vmem:[%s3046_s2] ss:$0 sm:$0xff] }
  0x20   : > { %2249 = vmatpush3.bf16.msra.mxu1 %v2364_v15  ;;  %2117 = vmatprep.subr.bf16.mxu0 %v2365_v16  ;;  %v564_v37 = vpack.c.bf16 %v561_v36, %v560_v34  ;;  %v2397_v57 = vld [vmem:[%s3047_s3] sm:$0xff]   ;;  %v2398_v14 = vld [vmem:[%s3052_s8 + $0x38] sm:$0xff]  }
  0x21   : > { %2250 = vmatprep.subr.bf16.mxu1 %v2470_v1 }
  0x23   : > { %2118 = vmatpush3.bf16.msra.mxu0 %v2366_v17 }
  0x24   : > { %2251 = vmatpush3.bf16.msra.mxu1 %v2367_v18  ;;  %2119 = vmatprep.subr.bf16.mxu0 %v2368_v19 }
  0x25   : > { %2252 = vmatprep.subr.bf16.mxu1 %v2470_v1 }
  0x27   : > { %2120 = vmatpush3.bf16.msra.mxu0 %v2369_v20  ;;  %v2399_v20 = vld [vmem:[%s3052_s8 + $0x30] sm:$0xff]  }
  0x28   : > { %2253 = vmatpush3.bf16.msra.mxu1 %v2370_v21  ;;  %2121 = vmatprep.subr.bf16.mxu0 %v2371_v22  ;;  %v2400_v21 = vld [vmem:[%s3052_s8 + $0x28] sm:$0xff]   ;;  %v2401_v22 = vld [vmem:[%s3052_s8 + $0x20] sm:$0xff]  }
  0x29   : > { %2254 = vmatprep.subr.bf16.mxu1 %v2470_v1 }
  0x2b   : > { %2122 = vmatpush3.bf16.msra.mxu0 %v2372_v26  ;;  %v2404_v26 = vld [vmem:[%s3052_s8 + $0x8] sm:$0xff]  }
  0x2c   : > { %2255 = vmatpush3.bf16.msra.mxu1 %v2373_v27  ;;  %2138 = vmatprep.subr.bf16.mxu0 %v2374_v28  ;;  %v2405_v27 = vld [vmem:[%s3052_s8] sm:$0xff]  }
  0x2d   : > { %2260 = vmatprep.subr.bf16.mxu1 %v2470_v1 }
  0x2e   : > { %797 = vmatmul.mubr.bf16.vlgmr.msra.gmra.mxu0 %v562_v35 }
  0x2f   : > { %2257 = vmatmul.mubr.bf16.vlgmr.msra.gmra.mxu1 %v564_v37  ;;  %2139 = vmatpush3.bf16.msra.mxu0 %v2376_v29 }
  0x30   : > { %2261 = vmatpush3.bf16.msra.mxu1 %v2375_v30  ;;  %2140 = vmatprep.subr.bf16.mxu0 %v2377_v31  ;;  %v2019_v31 = vld [vmem:[%s3048_s4] ss:$0 sm:$0xff] }
  0x31   : > { %2262 = vmatprep.subr.bf16.mxu1 %v2470_v1  ;;  %2276 = vmatprep.mubr.msk.bf16.mxu1 %vm2471_vm0, %v2470_v1 }
  0x33   : > { %2141 = vmatpush3.bf16.msra.mxu0 %v2379_v38 }
  0x34   : > { %2263 = vmatpush3.bf16.msra.mxu1 %v2378_v39  ;;  %2142 = vmatprep.subr.bf16.mxu0 %v2380_v40 }
  0x35   : > { %2264 = vmatprep.subr.bf16.mxu1 %v2470_v1 }
  0x37   : > { %2143 = vmatpush3.bf16.msra.mxu0 %v2382_v42  ;;  %v1141_v42 = vld [vmem:[%s3049_s5 + $0x8] sm:$0xff] }
  0x38   : > { %2265 = vmatpush3.bf16.msra.mxu1 %v2381_v41  ;;  %2144 = vmatprep.subr.bf16.mxu0 %v2383_v43  ;;  %v1140_v41 = vld [vmem:[%s3049_s5] sm:$0xff] }
  0x39   : > { %2266 = vmatprep.subr.bf16.mxu1 %v2470_v1 }
  0x3b   : > { %2145 = vmatpush3.bf16.msra.mxu0 %v2385_v45 }
  0x3c   : > { %2267 = vmatpush3.bf16.msra.mxu1 %v2384_v44  ;;  %2146 = vmatprep.subr.bf16.mxu0 %v2386_v46 }
  0x3d   : > { %2268 = vmatprep.subr.bf16.mxu1 %v2470_v1 }
  0x3f   : > { %2147 = vmatpush3.bf16.msra.mxu0 %v2388_v48 }
  0x40   : > { %2269 = vmatpush3.bf16.msra.mxu1 %v2387_v47  ;;  %2148 = vmatprep.subr.bf16.mxu0 %v2389_v49 }
  0x41   : > { %2270 = vmatprep.subr.bf16.mxu1 %v2470_v1 }
  0x43   : > { %2149 = vmatpush3.bf16.msra.mxu0 %v2391_v51 }
  0x44   : > { %2271 = vmatpush3.bf16.msra.mxu1 %v2390_v50  ;;  %2150 = vmatprep.subr.bf16.mxu0 %v2392_v52  ;;  %v1151_v52 = vld [vmem:[%s3050_s6] sm:$0x1] }
  0x45   : > { %2272 = vmatprep.subr.bf16.mxu1 %v2470_v1 }
  0x47   : > { %2151 = vmatpush3.bf16.msra.mxu0 %v2394_v54  ;;  %v1161_v54 = vld [vmem:[%s3050_s6 + $0x1] sm:$0x1] }
  0x48   : > { %2273 = vmatpush3.bf16.msra.mxu1 %v2393_v53  ;;  %2152 = vmatprep.subr.bf16.mxu0 %v2395_v55 }
  0x49   : > { %2274 = vmatprep.subr.bf16.mxu1 %v2470_v1 }
  0x4b   : > { %2153 = vmatpush3.bf16.msra.mxu0 %v2397_v57 }
  0x4c   : > { %2275 = vmatpush3.bf16.msra.mxu1 %v2396_v56  ;;  %2280 = vmatprep.subr.bf16.mxu0 %v2470_v1 }
  0xee   : > { %v2123_v58 = vpop.f32.mrf.mxu0 }
  0xef   : > { %v839_v59 = vpop.f32.mrf.mxu1 }
  0xf0   : > { %v2124_v61 = vpop.f32.mrf.mxu0 }
  0xf1   : > { %v2125_v62 = vadd.f32 %v2124_v61, %v2123_v58  ;;  %v2258_v63 = vpop.f32.mrf.mxu1  ;;  %v2408_v61 = vld [vmem:[%s3054_s10 + $0x38] sm:$0xff]  }
  0xf2   : > { %v2126_v0 = vpop.f32.mrf.mxu0  ;;  %v2410_v63 = vld [vmem:[%s3054_s10 + $0xb0] sm:$0xff]  }
  0xf3   : > { %v799_v2 = vadd.f32 %v2125_v62, %v1994_v60  ;;  %v842_v3 = vpop.f32.mrf.mxu1  ;;  %v2409_v62 = vld [vmem:[%s3054_s10 + $0x70] sm:$0xff]  }
  0xf4   : > { %v2127_v4 = vpop.f32.mrf.mxu0 }
  0xf5   : > { %v840_v5 = vadd.f32 %v839_v59, %v799_v2  ;;  %v2128_v6 = vadd.f32 %v2127_v4, %v2126_v0  ;;  %v2259_v7 = vpop.f32.mrf.mxu1  ;;  %v2406_v59 = vld [vmem:[%s3054_s10 + $0x78] sm:$0xff]   ;;  %v2411_v0 = vld [vmem:[%s3054_s10 + $0x30] sm:$0xff]  }
  0xf6   : > { %2178 = vmatprep.subr.bf16.mxu1 %v2406_v59  ;;  %v2432_v59 = vld [vmem:[%s3056_s12 + $0x38] sm:$0xff]  }
  0xf7   : > { %v846_v8 = vmax.f32 %v840_v5, 0.0  ;;  %v802_v9 = vadd.f32 %v2128_v6, %v1994_v60  ;;  %v2407_v60 = vld [vmem:[%s3054_s10 + $0xb8] sm:$0xff]   ;;  %v2413_v5 = vld [vmem:[%s3054_s10 + $0xa8] sm:$0xff]  }
  0xf8   : > { %v2414_v6 = vld [vmem:[%s3054_s10 + $0x28] sm:$0xff]  }
  0xf9   : > { %848 = vst [vmem:[#allocation2 + $0x1] sm:$0xff] %v846_v8  ;;  %v843_v10 = vadd.f32 %v842_v3, %v802_v9  ;;  %v2412_v3 = vld [vmem:[%s3054_s10 + $0x68] sm:$0xff]  }
  0xfb   : > { %v847_v11 = vmax.f32 %v843_v10, 0.0  ;;  %v2416_v10 = vld [vmem:[%s3054_s10 + $0xa0] sm:$0xff]  }
  0xfd   : > { %849 = vst [vmem:[#allocation2 + $0x9] sm:$0xff] %v847_v11  ;;  %v857_v12 = vpack.c.bf16 %v847_v11, %v846_v8  ;;  %v2415_v8 = vld [vmem:[%s3054_s10 + $0x60] sm:$0xff]  }
  0xfe   : > { %v2417_v11 = vld [vmem:[%s3054_s10 + $0x20] sm:$0xff]  }
  0xff   : > { %1090 = vmatprep.mubr.bf16.mxu0 %v857_v12  ;;  %v2418_v12 = vld [vmem:[%s3054_s10 + $0x58] sm:$0xff]  }
 0x100   : > { %v850_v13 = vld [vmem:[#allocation2] sm:$0xff] }
 0x104   : > { %v854_v15 = vld [vmem:[#allocation2 + $0x2] sm:$0xff]  ;;  %v855_v16 = vld [vmem:[#allocation2 + $0xa] sm:$0xff] }
 0x105   : > { %v851_v17 = vld [vmem:[#allocation2 + $0x8] sm:$0xff]  ;;  %v858_v18 = vpack.c.bf16 %v855_v16, %v854_v15  ;;  %v2421_v15 = vld [vmem:[%s3054_s10 + $0x50] sm:$0xff]  }
 0x106   : > { %v856_v19 = vpack.c.bf16 %v851_v17, %v850_v13  ;;  %v2419_v13 = vld [vmem:[%s3054_s10 + $0x98] sm:$0xff]   ;;  %v2422_v16 = vld [vmem:[%s3054_s10 + $0x90] sm:$0xff]  }
 0x107   : > { %2277 = vmatmul.mubr.bf16.vlgmr.msra.gmra.mxu1 %v858_v18  ;;  %v2423_v17 = vld [vmem:[%s3054_s10 + $0x10] sm:$0xff]   ;;  %v2424_v18 = vld [vmem:[%s3054_s10 + $0x48] sm:$0xff]  }
 0x108   : > { %1091 = vmatmul.mubr.bf16.vlgmr.msra.gmra.mxu0 %v856_v19  ;;  %2179 = vmatpush3.bf16.msra.mxu1 %v2408_v61  ;;  %v2425_v19 = vld [vmem:[%s3054_s10 + $0x88] sm:$0xff]   ;;  %v2433_v61 = vld [vmem:[%s3056_s12 + $0x70] sm:$0xff]  }
 0x109   : > { %2281 = vmatpush3.bf16.msra.mxu0 %v2398_v14  ;;  %2296 = vmatprep.mubr.msk.bf16.mxu0 %vm2471_vm0, %v2470_v1  ;;  %v2420_v14 = vld [vmem:[%s3054_s10 + $0x18] sm:$0xff]  }
 0x10a   : > { %2282 = vmatprep.subr.bf16.mxu0 %v2470_v1  ;;  %2180 = vmatprep.subr.bf16.mxu1 %v2409_v62  ;;  %v2434_v62 = vld [vmem:[%s3056_s12 + $0xb0] sm:$0xff]  }
 0x10c   : > { %2181 = vmatpush3.bf16.msra.mxu1 %v2411_v0  ;;  %v2436_v0 = vld [vmem:[%s3056_s12 + $0x68] sm:$0xff]  }
 0x10d   : > { %2283 = vmatpush3.bf16.msra.mxu0 %v2399_v20  ;;  %2182 = vmatprep.subr.bf16.mxu1 %v2412_v3  ;;  %v2426_v20 = vld [vmem:[%s3054_s10 + $0x8] sm:$0xff]  }
 0x10e   : > { %2284 = vmatprep.subr.bf16.mxu0 %v2470_v1  ;;  %v2438_v3 = vld [vmem:[%s3056_s12 + $0x28] sm:$0xff]  }
 0x110   : > { %2183 = vmatpush3.bf16.msra.mxu1 %v2414_v6  ;;  %v2441_v6 = vld [vmem:[%s3056_s12 + $0x20] sm:$0xff]  }
 0x111   : > { %2285 = vmatpush3.bf16.msra.mxu0 %v2400_v21  ;;  %2184 = vmatprep.subr.bf16.mxu1 %v2415_v8  ;;  %v2427_v21 = vld [vmem:[%s3054_s10 + $0x40] sm:$0xff]   ;;  %v2443_v8 = vld [vmem:[%s3056_s12 + $0x98] sm:$0xff]  }
 0x112   : > { %2286 = vmatprep.subr.bf16.mxu0 %v2470_v1 }
 0x114   : > { %2185 = vmatpush3.bf16.msra.mxu1 %v2417_v11  ;;  %v2446_v11 = vld [vmem:[%s3056_s12 + $0x90] sm:$0xff]  }
 0x115   : > { %2287 = vmatpush3.bf16.msra.mxu0 %v2401_v22  ;;  %2186 = vmatprep.subr.bf16.mxu1 %v2418_v12  ;;  %v2428_v22 = vld [vmem:[%s3054_s10 + $0x80] sm:$0xff]   ;;  %v2447_v12 = vld [vmem:[%s3056_s12 + $0x10] sm:$0xff]  }
 0x116   : > { %2288 = vmatprep.subr.bf16.mxu0 %v2470_v1 }
 0x118   : > { %2187 = vmatpush3.bf16.msra.mxu1 %v2420_v14  ;;  %v2449_v14 = vld [vmem:[%s3056_s12 + $0x88] sm:$0xff]  }
 0x119   : > { %2289 = vmatpush3.bf16.msra.mxu0 %v2402_v23  ;;  %2188 = vmatprep.subr.bf16.mxu1 %v2421_v15  ;;  %v2429_v23 = vld [vmem:[%s3054_s10] sm:$0xff]   ;;  %v2450_v15 = vld [vmem:[%s3056_s12 + $0x8] sm:$0xff]  }
 0x11a   : > { %2290 = vmatprep.subr.bf16.mxu0 %v2470_v1 }
 0x11c   : > { %2189 = vmatpush3.bf16.msra.mxu1 %v2423_v17  ;;  %v2452_v17 = vld [vmem:[%s3056_s12 + $0x80] sm:$0xff]  }
 0x11d   : > { %2291 = vmatpush3.bf16.msra.mxu0 %v2403_v24  ;;  %2190 = vmatprep.subr.bf16.mxu1 %v2424_v18  ;;  %v2430_v24 = vld [vmem:[%s3056_s12 + $0x78] sm:$0xff]   ;;  %v2453_v18 = vld [vmem:[%s3056_s12] sm:$0xff]  }
 0x11e   : > { %2292 = vmatprep.subr.bf16.mxu0 %v2470_v1 }
 0x120   : > { %2191 = vmatpush3.bf16.msra.mxu1 %v2426_v20 }
 0x121   : > { %2293 = vmatpush3.bf16.msra.mxu0 %v2404_v26  ;;  %2192 = vmatprep.subr.bf16.mxu1 %v2427_v21 }
 0x122   : > { %2294 = vmatprep.subr.bf16.mxu0 %v2470_v1 }
 0x124   : > { %2193 = vmatpush3.bf16.msra.mxu1 %v2429_v23 }
 0x125   : > { %2295 = vmatpush3.bf16.msra.mxu0 %v2405_v27  ;;  %2209 = vmatprep.subr.bf16.mxu1 %v2430_v24 }
 0x126   : > { %2300 = vmatprep.subr.bf16.mxu0 %v2470_v1 }
 0x128   : > { %2297 = vmatmul.mubr.bf16.vlgmr.msra.gmra.mxu0 %v2659_v25 }
 0x129   : > { %2316 = vmatprep.mubr.msk.bf16.mxu0 %vm2471_vm0, %v2470_v1  ;;  %2301 = vmatpush3.bf16.msra.mxu0 %v2407_v60 }
 0x12a   : > { %2302 = vmatprep.subr.bf16.mxu0 %v2470_v1 }
 0x12d   : > { %2303 = vmatpush3.bf16.msra.mxu0 %v2410_v63  ;;  %v2435_v63 = vld [vmem:[%s3056_s12 + $0x30] sm:$0xff]  }
 0x12e   : > { %2304 = vmatprep.subr.bf16.mxu0 %v2470_v1 }
 0x131   : > { %2305 = vmatpush3.bf16.msra.mxu0 %v2413_v5  ;;  %v2440_v5 = vld [vmem:[%s3056_s12 + $0xa0] sm:$0xff]  }
 0x132   : > { %2306 = vmatprep.subr.bf16.mxu0 %v2470_v1 }
 0x135   : > { %2307 = vmatpush3.bf16.msra.mxu0 %v2416_v10  ;;  %v2445_v10 = vld [vmem:[%s3056_s12 + $0x50] sm:$0xff]  }
 0x136   : > { %2308 = vmatprep.subr.bf16.mxu0 %v2470_v1 }
 0x139   : > { %2309 = vmatpush3.bf16.msra.mxu0 %v2419_v13  ;;  %v2448_v13 = vld [vmem:[%s3056_s12 + $0x48] sm:$0xff]  }
 0x13a   : > { %2310 = vmatprep.subr.bf16.mxu0 %v2470_v1 }
 0x13d   : > { %2311 = vmatpush3.bf16.msra.mxu0 %v2422_v16  ;;  %v2451_v16 = vld [vmem:[%s3056_s12 + $0x40] sm:$0xff]  }
 0x13e   : > { %2312 = vmatprep.subr.bf16.mxu0 %v2470_v1 }
 0x141   : > { %2313 = vmatpush3.bf16.msra.mxu0 %v2425_v19 }
 0x142   : > { %2314 = vmatprep.subr.bf16.mxu0 %v2470_v1 }
 0x145   : > { %2315 = vmatpush3.bf16.msra.mxu0 %v2428_v22  ;;  %v2053_v22 = vld [vmem:[%s3055_s11] ss:$0 sm:$0xff] }
 0x146   : > { %2320 = vmatprep.subr.bf16.mxu0 %v2470_v1 }
 0x1c7   : > { %v1133_v28 = vpop.f32.mrf.mxu1 }
 0x1c8   : > { %v2154_v29 = vpop.f32.mrf.mxu0 }
 0x1c9   : > { %v2278_v30 = vpop.f32.mrf.mxu1 }
 0x1ca   : > { %v2155_v32 = vpop.f32.mrf.mxu0 }
 0x1cb   : > { %v2156_v33 = vadd.f32 %v2155_v32, %v2154_v29  ;;  %v1136_v34 = vpop.f32.mrf.mxu1  ;;  %v1167_v29 = vld [vmem:[%s3051_s7 + $0x1] sm:$0x1] }
 0x1cc   : > { %v2157_v35 = vpop.f32.mrf.mxu0 }
 0x1cd   : > { %v1093_v36 = vadd.f32 %v2156_v33, %v2019_v31  ;;  %v2279_v37 = vpop.f32.mrf.mxu1 }
 0x1ce   : > { %v2158_v38 = vpop.f32.mrf.mxu0 }
 0x1cf   : > { %v2159_v39 = vadd.f32 %v2158_v38, %v2157_v35  ;;  %v2795_v40 = vadd.f32 %v1133_v28, %v1093_v36  ;;  %v1158_v28 = vld [vmem:[%s3051_s7] sm:$0x1] }
 0x1d1   : > { %v1096_v25 = vadd.f32 %v2159_v39, %v2019_v31  ;;  %v1142_v44 = vmul.f32 %v1140_v41, %v2795_v40  ;;  %v1288_v39 = vlaneseq }
 0x1d3   : > { %v2803_v43 = vadd.f32 %v1136_v34, %v1096_v25  ;;  %v2908_v25 = vshrl.u32 %v1288_v39, 7 }
 0x1d5   : > { %v1143_v45 = vmul.f32 %v1141_v42, %v2803_v43  ;;  %v1290_v41 = vsub.s32 0, %v2908_v25 }
 0x1d7   : > { %v1144_v46 = vadd.f32 %v1143_v45, %v1142_v44  ;;  %v2044_v44 = vld [vmem:[%s3053_s9] ss:$0 sm:$0xff] }
 0x1d9   : > { %v1145_v47 = vrot.slane %v1144_v46, 4 }
 0x1db   : > { %v1146_v48 = vadd.f32 %v1145_v47, %v1144_v46 }
 0x1dd   : > { %v1147_v49 = vrot.slane %v1146_v48, 2 }
 0x1df   : > { %v1148_v50 = vadd.f32 %v1147_v49, %v1146_v48 }
 0x1e1   : > { %v1149_v51 = vrot.slane %v1148_v50, 1 }
 0x1e3   : > { %v1150_v53 = vadd.f32 %v1149_v51, %v1148_v50 }
 0x1e5   : > { %v1152_v55 = vmul.f32 %v1151_v52, %v1150_v53  ;;  %v1162_v57 = vmul.f32 %v1161_v54, %v1150_v53 }
 0x1e7   : > { %v1154_v56 = vsel %vm1153_vm1, %v1152_v55, 0.0  ;;  %v1163_v58 = vsel %vm1153_vm1, %v1162_v57, 0.0 }
 0x1e8   : > { %1155 = vadd.xlane.f32.xlu0 %v1154_v56  ;;  %v2834_v2 = vpop.f32.mrf.mxu0 }
 0x1e9   : > { %v1282_v46 = vadd.f32 %v2044_v44, %v2834_v2  ;;  %v2437_v2 = vld [vmem:[%s3056_s12 + $0xa8] sm:$0xff]  }
 0x1ea   : > { %v2298_v4 = vpop.f32.mrf.mxu0 }
 0x1eb   : > { %v2439_v4 = vld [vmem:[%s3056_s12 + $0x60] sm:$0xff]  }
 0x1ec   : > { %1164 = vadd.xlane.f32.xlu0 %v1163_v58  ;;  %v2846_v7 = vpop.f32.mrf.mxu0 }
 0x1ed   : > { %v1285_v48 = vadd.f32 %v2044_v44, %v2846_v7  ;;  %v2442_v7 = vld [vmem:[%s3056_s12 + $0x58] sm:$0xff]  }
 0x1ee   : > { %v2299_v9 = vpop.f32.mrf.mxu0 }
 0x1ef   : > { %v2444_v9 = vld [vmem:[%s3056_s12 + $0x18] sm:$0xff]  }
 0x271   : > { %v1156_v26 = vpop.xlane.xlu0 %1155 }
 0x272   : > { %v1157_v27 = vmax.f32 %v1156_v26, 0.0 }
 0x274   : > { %v1159_v32 = vmul.f32 %v1158_v28, %v1157_v27 }
 0x275   : > { %v1165_v30 = vpop.xlane.xlu0 %1164 }
 0x276   : > { %v1166_v31 = vmax.f32 %v1165_v30, 0.0 }
 0x278   : > { %v1168_v33 = vmul.f32 %v1167_v29, %v1166_v31 }
 0x27a   : > { %v1169_v34 = vadd.f32 %v1168_v33, %v1159_v32 }
 0x27c   : > { %v1170_v35 = vsub.f32 0.0, %v1169_v34 }
 0x27e   : > { %v1171_v36 = vmul.f32 1.442695, %v1170_v35 }
 0x280   : > { %2454 = vpow2.f32 %v1171_v36 }
 0x28d   : > { %v2455_v37 = vpop.eup %2454 }
 0x28e   : > { %v1173_v38 = vadd.f32 1.0, %v2455_v37 }
 0x290   : > { %2456 = vrcp.f32 %v1173_v38 }
 0x29d   : > { %v2457_v42 = vpop.eup %2456 }
 0x29e   : > { %v1291_v45 = vrot.slane %v2457_v42, %v1290_v41 }
 0x2a0   : > { %v1292_v47 = vmul.f32 %v1291_v45, %v2795_v40  ;;  %v1293_v49 = vmul.f32 %v1291_v45, %v2803_v43  ;;  %v2431_v40 = vld [vmem:[%s3056_s12 + $0xb8] sm:$0xff]  }
 0x2a2   : > { %v1294_v50 = vadd.f32 %v1292_v47, %v1282_v46  ;;  %v1295_v51 = vadd.f32 %v1293_v49, %v1285_v48  ;;  %v2078_v49 = vld [vmem:[%s3057_s13] ss:$0 sm:$0xff] }
 0x2a4   : > { %v2920_v52 = vmax.f32 %v1294_v50, 0.0  ;;  %v2922_v53 = vmax.f32 %v1295_v51, 0.0 }
 0x2a6   : > { %1298 = vst [vmem:[#allocation2 + $0x1] sm:$0xff] %v2920_v52  ;;  %1299 = vst [vmem:[#allocation2 + $0x9] sm:$0xff] %v2922_v53  ;;  %v1307_v54 = vpack.c.bf16 %v2922_v53, %v2920_v52 }
 0x2a8   : > { %1540 = vmatprep.mubr.bf16.mxu1 %v1307_v54 }
 0x2ad   : > { %v1304_v55 = vld [vmem:[#allocation2 + $0x2] sm:$0xff]  ;;  %v1305_v43 = vld [vmem:[#allocation2 + $0xa] sm:$0xff] }
 0x2ae   : > { %v1300_v56 = vld [vmem:[#allocation2] sm:$0xff]  ;;  %v1308_v57 = vpack.c.bf16 %v1305_v43, %v1304_v55  ;;  %v1301_v58 = vld [vmem:[#allocation2 + $0x8] sm:$0xff] }
 0x2af   : > { %v1306_v60 = vpack.c.bf16 %v1301_v58, %v1300_v56 }
 0x2b0   : > { %2317 = vmatmul.mubr.bf16.vlgmr.msra.gmra.mxu0 %v1308_v57 }
 0x2b1   : > { %1541 = vmatmul.mubr.bf16.vlgmr.msra.gmra.mxu1 %v1306_v60  ;;  %2321 = vmatpush3.bf16.msra.mxu0 %v2431_v40  ;;  %v1884_v60 = vld [vmem:[%s3058_s14] sm:$0xff] }
 0x2b2   : > { %2210 = vmatpush3.bf16.msra.mxu1 %v2432_v59  ;;  %2322 = vmatprep.subr.bf16.mxu0 %v2470_v1 }
 0x2b3   : > { %2211 = vmatprep.subr.bf16.mxu1 %v2433_v61  ;;  %2336 = vmatprep.mubr.msk.bf16.mxu0 %vm2471_vm0, %v2470_v1  ;;  %v1885_v61 = vld [vmem:[%s3058_s14 + $0x8] sm:$0xff] }
 0x2b5   : > { %2323 = vmatpush3.bf16.msra.mxu0 %v2434_v62 }
 0x2b6   : > { %2324 = vmatprep.subr.bf16.mxu0 %v2470_v1  ;;  %2212 = vmatpush3.bf16.msra.mxu1 %v2435_v63 }
 0x2b7   : > { %2213 = vmatprep.subr.bf16.mxu1 %v2436_v0 }
 0x2b9   : > { %2325 = vmatpush3.bf16.msra.mxu0 %v2437_v2 }
 0x2ba   : > { %2214 = vmatpush3.bf16.msra.mxu1 %v2438_v3  ;;  %2326 = vmatprep.subr.bf16.mxu0 %v2470_v1 }
 0x2bb   : > { %2215 = vmatprep.subr.bf16.mxu1 %v2439_v4 }
 0x2bd   : > { %2327 = vmatpush3.bf16.msra.mxu0 %v2440_v5 }
 0x2be   : > { %2216 = vmatpush3.bf16.msra.mxu1 %v2441_v6  ;;  %2328 = vmatprep.subr.bf16.mxu0 %v2470_v1 }
 0x2bf   : > { %2217 = vmatprep.subr.bf16.mxu1 %v2442_v7 }
 0x2c1   : > { %2329 = vmatpush3.bf16.msra.mxu0 %v2443_v8  ;;  %v1895_v8 = vld [vmem:[%s3059_s15] sm:$0x1] }
 0x2c2   : > { %2218 = vmatpush3.bf16.msra.mxu1 %v2444_v9  ;;  %2330 = vmatprep.subr.bf16.mxu0 %v2470_v1 }
 0x2c3   : > { %2219 = vmatprep.subr.bf16.mxu1 %v2445_v10  ;;  %v1904_v10 = vld [vmem:[%s3059_s15 + $0x1] sm:$0x1] }
 0x2c5   : > { %2331 = vmatpush3.bf16.msra.mxu0 %v2446_v11 }
 0x2c6   : > { %2220 = vmatpush3.bf16.msra.mxu1 %v2447_v12  ;;  %2332 = vmatprep.subr.bf16.mxu0 %v2470_v1 }
 0x2c7   : > { %2221 = vmatprep.subr.bf16.mxu1 %v2448_v13 }
 0x2c9   : > { %2333 = vmatpush3.bf16.msra.mxu0 %v2449_v14 }
 0x2ca   : > { %2222 = vmatpush3.bf16.msra.mxu1 %v2450_v15  ;;  %2334 = vmatprep.subr.bf16.mxu0 %v2470_v1 }
 0x2cb   : > { %2223 = vmatprep.subr.bf16.mxu1 %v2451_v16 }
 0x2cd   : > { %2335 = vmatpush3.bf16.msra.mxu0 %v2452_v17  ;;  %v1901_v17 = vld [vmem:[%s3060_s16] sm:$0x1] }
 0x2ce   : > { %2224 = vmatpush3.bf16.msra.mxu1 %v2453_v18  ;;  %v1910_v18 = vld [vmem:[%s3060_s16 + $0x1] sm:$0x1] }
 0x370   : > { %v1583_v19 = vpop.f32.mrf.mxu0 }
 0x371   : > { %v2194_v20 = vpop.f32.mrf.mxu1 }
 0x372   : > { %v2318_v21 = vpop.f32.mrf.mxu0 }
 0x373   : > { %v2195_v23 = vpop.f32.mrf.mxu1 }
 0x374   : > { %v2196_v24 = vadd.f32 %v2195_v23, %v2194_v20  ;;  %v1586_v26 = vpop.f32.mrf.mxu0 }
 0x375   : > { %v2197_v27 = vpop.f32.mrf.mxu1 }
 0x376   : > { %v1543_v28 = vadd.f32 %v2196_v24, %v2053_v22  ;;  %v2319_v29 = vpop.f32.mrf.mxu0 }
 0x377   : > { %v2198_v30 = vpop.f32.mrf.mxu1 }
 0x378   : > { %v1584_v31 = vadd.f32 %v1583_v19, %v1543_v28  ;;  %v2199_v32 = vadd.f32 %v2198_v30, %v2197_v27 }
 0x37a   : > { %v1590_v1 = vmax.f32 %v1584_v31, 0.0  ;;  %v1546_v33 = vadd.f32 %v2199_v32, %v2053_v22 }
 0x37c   : > { %1592 = vst [vmem:[#allocation2 + $0x1] sm:$0xff] %v1590_v1  ;;  %v1587_v34 = vadd.f32 %v1586_v26, %v1546_v33 }
 0x37e   : > { %v1591_v35 = vmax.f32 %v1587_v34, 0.0 }
 0x380   : > { %1593 = vst [vmem:[#allocation2 + $0x9] sm:$0xff] %v1591_v35  ;;  %v1601_v36 = vpack.c.bf16 %v1591_v35, %v1590_v1 }
 0x382   : > { %1834 = vmatprep.mubr.bf16.mxu1 %v1601_v36 }
 0x383   : > { %v1594_v37 = vld [vmem:[#allocation2] sm:$0xff] }
 0x387   : > { %v1598_v38 = vld [vmem:[#allocation2 + $0x2] sm:$0xff]  ;;  %v1599_v39 = vld [vmem:[#allocation2 + $0xa] sm:$0xff] }
 0x388   : > { %v1595_v42 = vld [vmem:[#allocation2 + $0x8] sm:$0xff]  ;;  %v1602_v44 = vpack.c.bf16 %v1599_v39, %v1598_v38 }
 0x389   : > { %v1600_v45 = vpack.c.bf16 %v1595_v42, %v1594_v37 }
 0x38a   : > { %2337 = vmatmul.mubr.bf16.vlgmr.msra.gmra.mxu0 %v1602_v44 }
 0x38b   : > { %1835 = vmatmul.mubr.bf16.vlgmr.msra.gmra.mxu1 %v1600_v45 }
 0x44a   : > { %v1877_v46 = vpop.f32.mrf.mxu0 }
 0x44b   : > { %v2225_v47 = vpop.f32.mrf.mxu1 }
 0x44c   : > { %v2338_v48 = vpop.f32.mrf.mxu0 }
 0x44d   : > { %v2226_v50 = vpop.f32.mrf.mxu1 }
 0x44e   : > { %v2227_v51 = vadd.f32 %v2226_v50, %v2225_v47  ;;  %v1880_v54 = vpop.f32.mrf.mxu0 }
 0x44f   : > { %v2228_v40 = vpop.f32.mrf.mxu1 }
 0x450   : > { %v1837_v55 = vadd.f32 %v2227_v51, %v2078_v49  ;;  %v2339_v43 = vpop.f32.mrf.mxu0 }
 0x451   : > { %v2229_v56 = vpop.f32.mrf.mxu1 }
 0x452   : > { %v2230_v57 = vadd.f32 %v2229_v56, %v2228_v40  ;;  %v1878_v58 = vadd.f32 %v1877_v46, %v1837_v55 }
 0x454   : > { %v1840_v59 = vadd.f32 %v2230_v57, %v2078_v49  ;;  %v1886_v63 = vmul.f32 %v1884_v60, %v1878_v58 }
 0x456   : > { %v1881_v62 = vadd.f32 %v1880_v54, %v1840_v59 }
 0x458   : > { %v1887_v0 = vmul.f32 %v1885_v61, %v1881_v62 }
 0x45a   : > { %v1888_v2 = vadd.f32 %v1887_v0, %v1886_v63 }
 0x45c   : > { %v1889_v3 = vrot.slane %v1888_v2, 4 }
 0x45e   : > { %v1890_v4 = vadd.f32 %v1889_v3, %v1888_v2 }
 0x460   : > { %v1891_v5 = vrot.slane %v1890_v4, 2 }
 0x462   : > { %v1892_v6 = vadd.f32 %v1891_v5, %v1890_v4 }
 0x464   : > { %v1893_v7 = vrot.slane %v1892_v6, 1 }
 0x466   : > { %v1894_v9 = vadd.f32 %v1893_v7, %v1892_v6 }
 0x468   : > { %v1896_v11 = vmul.f32 %v1895_v8, %v1894_v9  ;;  %v1905_v13 = vmul.f32 %v1904_v10, %v1894_v9 }
 0x46a   : > { %v1897_v12 = vsel %vm1153_vm1, %v1896_v11, 0.0  ;;  %v1906_v14 = vsel %vm1153_vm1, %v1905_v13, 0.0 }
 0x46b   : > { %1898 = vadd.xlane.f32.xlu1 %v1897_v12 }
 0x46f   : > { %1907 = vadd.xlane.f32.xlu1 %v1906_v14 }
 0x4f4   : > { %v1899_v15 = vpop.xlane.xlu1 %1898 }
 0x4f5   : > { %v1900_v16 = vmax.f32 %v1899_v15, 0.0 }
 0x4f7   : > { %v1902_v21 = vmul.f32 %v1901_v17, %v1900_v16 }
 0x4f8   : > { %v1908_v19 = vpop.xlane.xlu1 %1907 }
 0x4f9   : > { %v1909_v20 = vmax.f32 %v1908_v19, 0.0 }
 0x4fb   : > { %v1911_v22 = vmul.f32 %v1910_v18, %v1909_v20 }
 0x4fd   : > { %v1912_v23 = vadd.f32 %v1911_v22, %v1902_v21 }
 0x4ff   : > { %v1913_v24 = vsub.f32 0.0, %v1912_v23 }
 0x501   : > { %v1914_v26 = vmul.f32 1.442695, %v1913_v24 }
 0x503   : > { %2458 = vpow2.f32 %v1914_v26 }
 0x510   : > { %v2459_v27 = vpop.eup %2458 }
 0x511   : > { %v1916_v28 = vadd.f32 1.0, %v2459_v27 }
 0x513   : > { %2460 = vrcp.f32 %v1916_v28 }
 0x520   : > { %v2461_v29 = vpop.eup %2460 }
 0x521   : > { %v1921_v30 = vrot.slane %v2461_v29, %v1290_v41 }
 0x523   : > { %v1922_v31 = vmul.f32 %v1921_v30, %v1878_v58  ;;  %v1923_v32 = vmul.f32 %v1921_v30, %v1881_v62 }
 0x525   : > { %v1924_v1 = vadd.f32 %v1922_v31, %v2920_v52  ;;  %v1925_v33 = vadd.f32 %v1923_v32, %v2922_v53 }
 0x527   : > { %v1926_v34 = vmax.f32 %v1924_v1, 0.0  ;;  %v1927_v35 = vmax.f32 %v1925_v33, 0.0 }
 0x529   : > { %1928 = vst [vmem:[%s548_s20] sm:$0xff] %v1926_v34  ;;  %1929 = vst [vmem:[%s548_s20 + $0x8] sm:$0xff] %v1927_v35 }
 0x52a PF: > { %s3069_s21 = sld [smem:[#allocation3_spill]] }
 0x530   : > { %s27_s24 = sadd.s32 1, %s3069_s21  }
 0x531   : > { %p24_p4 = scmp.ge.s32.totalorder %s27_s24, 4  }
 0x533   :  { %26 = sbr.rel (!%p24_p4) target bundleno = 3 (0x3), region = 118 }

</bundles_post_ra>
